<compile_context>
chip_gen: v5e
topology: v5e:2x2
jax: 0.10.0
libtpu: 0.0.40
codegen_flags: <defaults>
</compile_context>

<pallas_src>
import jax
import jax.numpy as jnp
from jax import lax
from jax.experimental import pallas as pl
from jax.experimental.pallas import tpu as pltpu


def _bilinear_kernel(x_ref, w_ref, y_ref, wxb_ref, wyb_ref, wc_ref, o_ref,
                     xw_ref, xb_ref):
    """Grid = (n_out, batch, Sx-tile, Sy-tile), Sy innermost ('arbitrary').

    x_ref:   (1, TSx, D)    current batch / Sx tile            (compute dtype)
    w_ref:   (1, D, D)      W[o, :D, :D] core block
    y_ref:   (1, TSy, D)    current batch / Sy tile
    wxb_ref: (1, 1, D)      W[o, :D, D]  x-side bias column (zeros if !bias_y)
    wyb_ref: (1, 1, D)      W[o, D, :D]  y-side bias row    (zeros if !bias_x)
    wc_ref:  (1, 1, 1) f32  W[o, D, D]   corner constant    (zero unless both)
    o_ref:   (1, 1, TSx, TSy)
    xw_ref:  (TSx, D)       scratch cache:  x @ Wcore + w_yb   (compute dtype)
    xb_ref:  (TSx, 1) f32   scratch cache:  x . w_xb + corner
    """
    # ---- per-(o, b, i) prologue, cached across the inner Sy sweep ----------
    @pl.when(pl.program_id(3) == 0)
    def _():
        x = x_ref[0]                                               # (TSx, D)
        xw = jnp.dot(x, w_ref[0], preferred_element_type=jnp.float32)
        xw = xw + wyb_ref[0].astype(jnp.float32)       # fold y-side bias row
        xw_ref[...] = xw.astype(xw_ref.dtype)
        xb = jnp.sum(x.astype(jnp.float32) * wxb_ref[0].astype(jnp.float32),
                     axis=-1, keepdims=True)                       # (TSx, 1)
        xb_ref[...] = xb + wc_ref[0].astype(jnp.float32)   # fold corner const

    # ---- per-Sy-tile work: one MXU contraction + one broadcast add ---------
    # 'NT' contraction on the last dims; no explicit transpose of the y tile.
    s = lax.dot_general(xw_ref[...], y_ref[0],
                        (((1,), (1,)), ((), ())),
                        preferred_element_type=jnp.float32)       # (TSx, TSy)
    o_ref[0, 0] = (s + xb_ref[...]).astype(o_ref.dtype)


def _round_up(v, m):
    return -(-v // m) * m


def _vmem_capacity_bytes():
    """Physical VMEM per TensorCore.  Avoids the old silent 64-MiB fallback
    that halved tiles on 128-MiB parts (v5e / v6e)."""
    try:
        info = pltpu.get_tpu_info()
        cap = int(getattr(info, "vmem_capacity_bytes", 0))
        if cap > 0:
            return cap
    except Exception:
        pass
    try:
        kind = jax.devices()[0].device_kind.lower()
    except Exception:
        kind = ""
    if "7" in kind:                                  # v7x: 64 MiB / TC
        return 64 * 1024 * 1024
    if any(t in kind for t in ("v4", "v5", "v6")):   # v4/v5e/v5p/v6e: 128 MiB
        return 128 * 1024 * 1024
    return 64 * 1024 * 1024                          # unknown: conservative


def _per_step_bytes(tsx, tsy, d, in_isz, out_isz):
    """Approximate VMEM footprint of one pipelined grid step."""
    return (2 * tsx * d * in_isz          # x tile (double-buffered)
            + 2 * tsy * d * in_isz        # y tile (double-buffered)
            + 2 * d * d * in_isz          # W core block (double-buffered)
            + 4 * d * in_isz              # bias row + column blocks
            + 2 * tsx * tsy * out_isz     # output tile (double-buffered)
            + tsx * d * in_isz            # xw cache scratch (compute dtype)
            + tsx * 4                     # xb cache scratch (f32)
            + tsx * d * 4                 # f32 xw intermediate (j==0 step)
            + tsx * tsy * 4)              # f32 s intermediate


def _pick_tiles(Sx, Sy, d, in_isz, out_isz, budget):
    """Largest (tile_sx, tile_sy), multiples of 128, fitting the VMEM budget.
    Sx tile is maximized first (y re-read HBM traffic ~ Sx / tile_sx)."""
    cands_x = [c for c in (1024, 768, 512, 384, 256, 128) if c <= Sx] or [Sx]
    cands_y = [c for c in (1024, 768, 512, 384, 256, 128) if c <= Sy] or [Sy]
    for tsx in cands_x:
        for tsy in cands_y:
            if _per_step_bytes(tsx, tsy, d, in_isz, out_isz) <= budget:
                return tsx, tsy
    return cands_x[-1], cands_y[-1]


def bilinear(x, y, weight, bias_x=True, bias_y=True, *,
             tile_sx=None, tile_sy=None,
             out_dtype=jnp.float32, compute_dtype=jnp.bfloat16):
    """x: [B, Sx, n_in], y: [B, Sy, n_in],
    weight: [n_out, n_in + bias_x, n_in + bias_y].

    Returns [B, n_out, Sx, Sy], squeezed on axis 1 if n_out == 1 (matching the
    PyTorch module's `.squeeze(1)` when n_out == 1).

    compute_dtype defaults to bfloat16 (fast MXU path, f32 accumulation);
    pass jnp.float32 for exact parity with a float32 reference.
    out_dtype can be bfloat16 where downstream tolerates it (halves the output
    HBM write, the dominant irreducible term on v5e/v6e)."""
    B, Sx, n_in = x.shape
    By, Sy, n_in_y = y.shape
    assert B == By and n_in_y == n_in
    n_out = weight.shape[0]
    assert weight.shape == (n_out, n_in + bool(bias_x), n_in + bool(bias_y))

    # ---- split the weight once (no ones-concat of x / y in HBM) ------------
    w_core = weight[:, :n_in, :n_in]
    if bias_y:
        w_xb = weight[:, :n_in, n_in].reshape(n_out, 1, n_in)
    else:
        w_xb = jnp.zeros((n_out, 1, n_in), weight.dtype)
    if bias_x:
        w_yb = weight[:, n_in, :n_in].reshape(n_out, 1, n_in)
    else:
        w_yb = jnp.zeros((n_out, 1, n_in), weight.dtype)
    if bias_x and bias_y:
        w_c = weight[:, n_in, n_in].reshape(n_out, 1, 1)
    else:
        w_c = jnp.zeros((n_out, 1, 1), weight.dtype)

    # ---- lane-align the contraction dim for realistic (non-multiple-of-128)
    #      parser widths; exact (zero padding contributes nothing). ----------
    d = n_in
    if n_in > 128 and n_in % 128 != 0:
        d = _round_up(n_in, 128)
        pad = d - n_in
        x = jnp.pad(x, ((0, 0), (0, 0), (0, pad)))
        y = jnp.pad(y, ((0, 0), (0, 0), (0, pad)))
        w_core = jnp.pad(w_core, ((0, 0), (0, pad), (0, pad)))
        w_xb = jnp.pad(w_xb, ((0, 0), (0, 0), (0, pad)))
        w_yb = jnp.pad(w_yb, ((0, 0), (0, 0), (0, pad)))

    # ---- cast to the compute dtype (bf16 default: native MXU, half the DMA) -
    if compute_dtype is None:
        compute_dtype = x.dtype
    compute_dtype = jnp.dtype(compute_dtype)
    x = x.astype(compute_dtype)
    y = y.astype(compute_dtype)
    w_core = w_core.astype(compute_dtype)
    w_xb = w_xb.astype(compute_dtype)
    w_yb = w_yb.astype(compute_dtype)
    w_c = w_c.astype(jnp.float32)

    # ---- chip / dtype / n_in aware tile solver ------------------------------
    vmem_cap = _vmem_capacity_bytes()
    budget = int(0.72 * vmem_cap)
    in_isz = compute_dtype.itemsize
    out_isz = jnp.dtype(out_dtype).itemsize
    auto_tsx, auto_tsy = _pick_tiles(Sx, Sy, d, in_isz, out_isz, budget)
    tile_sx = auto_tsx if tile_sx is None else min(tile_sx, Sx)
    tile_sy = auto_tsy if tile_sy is None else min(tile_sy, Sy)

    per_step = _per_step_bytes(tile_sx, tile_sy, d, in_isz, out_isz)
    vmem_limit = int(min(int(0.9 * vmem_cap),
                         max(32 * 1024 * 1024,
                             int(1.25 * per_step) + (2 << 20))))

    # Grid: weight channel outermost (W stays resident across the batch), Sy
    # tile innermost & 'arbitrary' (the xw/xb cache is carried across it).
    # With n_out == 1 (typical arc scorer) the B / Sx-tile 'parallel' axes
    # carry the v7x megacore split.
    grid = (n_out, B, pl.cdiv(Sx, tile_sx), pl.cdiv(Sy, tile_sy))

    out = pl.pallas_call(
        _bilinear_kernel,
        out_shape=jax.ShapeDtypeStruct((B, n_out, Sx, Sy), out_dtype),
        grid_spec=pltpu.PrefetchScalarGridSpec(
            num_scalar_prefetch=0,
            grid=grid,
            in_specs=[
                pl.BlockSpec((1, tile_sx, d), lambda o, b, i, j: (b, i, 0)),
                pl.BlockSpec((1, d, d),       lambda o, b, i, j: (o, 0, 0)),
                pl.BlockSpec((1, tile_sy, d), lambda o, b, i, j: (b, j, 0)),
                pl.BlockSpec((1, 1, d),       lambda o, b, i, j: (o, 0, 0)),
                pl.BlockSpec((1, 1, d),       lambda o, b, i, j: (o, 0, 0)),
                pl.BlockSpec((1, 1, 1),       lambda o, b, i, j: (o, 0, 0)),
            ],
            out_specs=pl.BlockSpec((1, 1, tile_sx, tile_sy),
                                   lambda o, b, i, j: (b, o, i, j)),
            scratch_shapes=[
                pltpu.VMEM((tile_sx, d), compute_dtype),  # xw + w_yb cache
                pltpu.VMEM((tile_sx, 1), jnp.float32),    # x.w_xb + corner
            ],
        ),
        compiler_params=pltpu.CompilerParams(
            dimension_semantics=("parallel", "parallel", "parallel",
                                 "arbitrary"),
            vmem_limit_bytes=vmem_limit),
    )(x, w_core, y, w_xb, w_yb, w_c)

    if n_out == 1:
        out = jnp.squeeze(out, axis=1)   # matches torch .squeeze(1)
    return out


def _reference(x, y, weight, bias_x, bias_y):
    if bias_x:
        x = jnp.concatenate([x, jnp.ones_like(x[..., :1])], axis=-1)
    if bias_y:
        y = jnp.concatenate([y, jnp.ones_like(y[..., :1])], axis=-1)
    s = jnp.einsum('bxi,oij,byj->boxy', x, weight, y)
    if weight.shape[0] == 1:
        s = jnp.squeeze(s, axis=1)
    return s


if __name__ == "__main__":
    key = jax.random.PRNGKey(0)
    ks = jax.random.split(key, 10)

    # ---- Config 1: module defaults (n_out=1, bias_x=bias_y=True) -----------
    # Small shapes consistent with the module: batch=2, seq=8, hidden(n_in)=32.
    B, S, n_in, n_out = 2, 8, 32, 1
    x = jax.random.normal(ks[0], (B, S, n_in), dtype=jnp.float32)
    y = jax.random.normal(ks[1], (B, S, n_in), dtype=jnp.float32)
    # NOTE: the PyTorch module zero-inits the weight (trivial output); use a
    # deterministic random weight of the same shape for a non-trivial check.
    weight = 0.02 * jax.random.normal(ks[2], (n_out, n_in + 1, n_in + 1),
                                      dtype=jnp.float32)
    ref = _reference(x, y, weight, True, True)

    # Exact check: f32 compute path.
    out = jax.block_until_ready(
        bilinear(x, y, weight, True, True, compute_dtype=jnp.float32))
    assert out.shape == (B, S, S), out.shape
    assert jnp.allclose(out, ref, atol=1e-4, rtol=1e-4), \
        float(jnp.max(jnp.abs(out - ref)))

    # Default (bfloat16) compute path: looser tolerance vs the f32 reference.
    out_bf = jax.block_until_ready(bilinear(x, y, weight, True, True))
    assert out_bf.shape == (B, S, S), out_bf.shape
    assert jnp.allclose(out_bf, ref, atol=5e-2, rtol=5e-2), \
        float(jnp.max(jnp.abs(out_bf - ref)))

    # ---- Config 2: n_out > 1, bias_y=False, Sx != Sy ------------------------
    n_out2, Sx2, Sy2 = 2, 16, 8
    x2 = jax.random.normal(ks[3], (B, Sx2, n_in), dtype=jnp.float32)
    y2 = jax.random.normal(ks[4], (B, Sy2, n_in), dtype=jnp.float32)
    weight2 = 0.02 * jax.random.normal(ks[5], (n_out2, n_in + 1, n_in),
                                       dtype=jnp.float32)
    out2 = jax.block_until_ready(
        bilinear(x2, y2, weight2, True, False, compute_dtype=jnp.float32))
    ref2 = _reference(x2, y2, weight2, True, False)
    assert out2.shape == (B, n_out2, Sx2, Sy2), out2.shape
    assert jnp.allclose(out2, ref2, atol=1e-4, rtol=1e-4), \
        float(jnp.max(jnp.abs(out2 - ref2)))

    # ---- Config 3: multi-tile grid, ragged edge tiles, K padding, bias_x=False,
    #      exercises the per-(o,b,i) xw/xb cache across several inner Sy steps.
    B3, Sx3, Sy3, n_in3 = 1, 200, 136, 160
    x3 = jax.random.normal(ks[6], (B3, Sx3, n_in3), dtype=jnp.float32)
    y3 = jax.random.normal(ks[7], (B3, Sy3, n_in3), dtype=jnp.float32)
    weight3 = 0.02 * jax.random.normal(ks[8], (1, n_in3, n_in3 + 1),
                                       dtype=jnp.float32)
    out3 = jax.block_until_ready(
        bilinear(x3, y3, weight3, False, True, compute_dtype=jnp.float32,
                 tile_sx=128, tile_sy=128))
    ref3 = _reference(x3, y3, weight3, False, True)
    assert out3.shape == (B3, Sx3, Sy3), out3.shape
    assert jnp.allclose(out3, ref3, atol=1e-3, rtol=1e-3), \
        float(jnp.max(jnp.abs(out3 - ref3)))

    print("KERNEL_OK")
</pallas_src>

<mosaic_0001>
module attributes {stable_mosaic.version = 11 : i64} {
  func.func @_bilinear_kernel(%arg0: i32, %arg1: i32, %arg2: i32, %arg3: i32, %arg4: memref<1x8x32xf32, #tpu.memory_space<vmem>>, %arg5: memref<1x32x32xf32, #tpu.memory_space<vmem>>, %arg6: memref<1x8x32xf32, #tpu.memory_space<vmem>>, %arg7: memref<1x1x32xf32, #tpu.memory_space<vmem>>, %arg8: memref<1x1x32xf32, #tpu.memory_space<vmem>>, %arg9: memref<1x1x1xf32, #tpu.memory_space<vmem>>, %arg10: memref<1x1x8x8xf32, #tpu.memory_space<vmem>>, %arg11: memref<8x32xf32, #tpu.memory_space<vmem>>, %arg12: memref<8x1xf32, #tpu.memory_space<vmem>>) attributes {dimension_semantics = [#tpu.dimension_semantics<parallel>, #tpu.dimension_semantics<parallel>, #tpu.dimension_semantics<parallel>, #tpu.dimension_semantics<arbitrary>], iteration_bounds = array<i64: 1, 2, 1, 1>, scalar_prefetch = 0 : i64, scratch_operands = 2 : i64, tpu.core_type = #tpu.core_type<tc>, window_params = [{transform_indices = @transform_0, window_bounds = array<i64: 1, 8, 32>}, {transform_indices = @transform_1, window_bounds = array<i64: 1, 32, 32>}, {transform_indices = @transform_2, window_bounds = array<i64: 1, 8, 32>}, {transform_indices = @transform_3, window_bounds = array<i64: 1, 1, 32>}, {transform_indices = @transform_4, window_bounds = array<i64: 1, 1, 32>}, {transform_indices = @transform_5, window_bounds = array<i64: 1, 1, 1>}, {transform_indices = @transform_6, window_bounds = array<i64: 1, 1, 8, 8>}]} {
    %c0_i32 = arith.constant 0 : i32
    %0 = arith.cmpi eq, %arg3, %c0_i32 : i32
    %1 = arith.extui %0 : i1 to i32
    %c0_i32_0 = arith.constant 0 : i32
    %2 = arith.cmpi ne, %1, %c0_i32_0 : i32
    scf.if %2 {
      %c0_11 = arith.constant 0 : index
      %c0_12 = arith.constant 0 : index
      %c0_13 = arith.constant 0 : index
      %13 = vector.load %arg4[%c0_11, %c0_12, %c0_13] : memref<1x8x32xf32, #tpu.memory_space<vmem>>, vector<1x8x32xf32>
      %14 = vector.shape_cast %13 : vector<1x8x32xf32> to vector<8x32xf32>
      %c0_14 = arith.constant 0 : index
      %c0_15 = arith.constant 0 : index
      %c0_16 = arith.constant 0 : index
      %15 = vector.load %arg5[%c0_14, %c0_15, %c0_16] : memref<1x32x32xf32, #tpu.memory_space<vmem>>, vector<1x32x32xf32>
      %16 = vector.shape_cast %15 : vector<1x32x32xf32> to vector<32x32xf32>
      %cst_17 = arith.constant dense<0.000000e+00> : vector<8x32xf32>
      %17 = tpu.matmul %14, %16, %cst_17 {dimension_numbers = #tpu.dot_dimension_numbers<[1], [0], [0], [1], [0, 0, 1, 1], [], []>} : vector<8x32xf32>, vector<32x32xf32>, vector<8x32xf32> -> vector<8x32xf32>
      %c0_18 = arith.constant 0 : index
      %c0_19 = arith.constant 0 : index
      %c0_20 = arith.constant 0 : index
      %18 = vector.load %arg8[%c0_18, %c0_19, %c0_20] : memref<1x1x32xf32, #tpu.memory_space<vmem>>, vector<1x1x32xf32>
      %19 = vector.shape_cast %18 : vector<1x1x32xf32> to vector<1x32xf32>
      %20 = vector.broadcast %19 : vector<1x32xf32> to vector<8x32xf32>
      %21 = arith.addf %17, %20 : vector<8x32xf32>
      %c0_21 = arith.constant 0 : index
      %c0_22 = arith.constant 0 : index
      %22 = vector.load %arg11[%c0_21, %c0_22] : memref<8x32xf32, #tpu.memory_space<vmem>>, vector<8x32xf32>
      tpu.vector_store %arg11[%c0_21, %c0_22], %21 {strides = array<i32>} : memref<8x32xf32, #tpu.memory_space<vmem>>, vector<8x32xf32>,
      %c0_23 = arith.constant 0 : index
      %c0_24 = arith.constant 0 : index
      %c0_25 = arith.constant 0 : index
      %23 = vector.load %arg7[%c0_23, %c0_24, %c0_25] : memref<1x1x32xf32, #tpu.memory_space<vmem>>, vector<1x1x32xf32>
      %24 = vector.shape_cast %23 : vector<1x1x32xf32> to vector<1x32xf32>
      %25 = vector.broadcast %24 : vector<1x32xf32> to vector<8x32xf32>
      %26 = arith.mulf %14, %25 : vector<8x32xf32>
      %cst_26 = arith.constant dense<0.000000e+00> : vector<8xf32>
      %27 = vector.multi_reduction <add>, %26, %cst_26 [1] : vector<8x32xf32> to vector<8xf32>
      %28 = vector.shape_cast %27 : vector<8xf32> to vector<8x1xf32>
      %c0_27 = arith.constant 0 : index
      %c0_28 = arith.constant 0 : index
      %c0_29 = arith.constant 0 : index
      %29 = vector.load %arg9[%c0_27, %c0_28, %c0_29] : memref<1x1x1xf32, #tpu.memory_space<vmem>>, vector<1x1x1xf32>
      %30 = vector.shape_cast %29 : vector<1x1x1xf32> to vector<1x1xf32>
      %31 = vector.broadcast %30 : vector<1x1xf32> to vector<8x1xf32>
      %32 = arith.addf %28, %31 : vector<8x1xf32>
      %c0_30 = arith.constant 0 : index
      %c0_31 = arith.constant 0 : index
      %33 = vector.load %arg12[%c0_30, %c0_31] : memref<8x1xf32, #tpu.memory_space<vmem>>, vector<8x1xf32>
      tpu.vector_store %arg12[%c0_30, %c0_31], %32 {strides = array<i32>} : memref<8x1xf32, #tpu.memory_space<vmem>>, vector<8x1xf32>,
    } else {
    }
    %c0 = arith.constant 0 : index
    %c0_1 = arith.constant 0 : index
    %3 = vector.load %arg11[%c0, %c0_1] : memref<8x32xf32, #tpu.memory_space<vmem>>, vector<8x32xf32>
    %c0_2 = arith.constant 0 : index
    %c0_3 = arith.constant 0 : index
    %c0_4 = arith.constant 0 : index
    %4 = vector.load %arg6[%c0_2, %c0_3, %c0_4] : memref<1x8x32xf32, #tpu.memory_space<vmem>>, vector<1x8x32xf32>
    %5 = vector.shape_cast %4 : vector<1x8x32xf32> to vector<8x32xf32>
    %cst = arith.constant dense<0.000000e+00> : vector<8x8xf32>
    %6 = tpu.matmul %3, %5, %cst {dimension_numbers = #tpu.dot_dimension_numbers<[1], [1], [0], [0], [0, 0, 1, 0], [], []>} : vector<8x32xf32>, vector<8x32xf32>, vector<8x8xf32> -> vector<8x8xf32>
    %c0_5 = arith.constant 0 : index
    %c0_6 = arith.constant 0 : index
    %7 = vector.load %arg12[%c0_5, %c0_6] : memref<8x1xf32, #tpu.memory_space<vmem>>, vector<8x1xf32>
    %8 = vector.broadcast %7 : vector<8x1xf32> to vector<8x8xf32>
    %9 = arith.addf %6, %8 : vector<8x8xf32>
    %c0_7 = arith.constant 0 : index
    %c0_8 = arith.constant 0 : index
    %c0_9 = arith.constant 0 : index
    %c0_10 = arith.constant 0 : index
    %10 = vector.load %arg10[%c0_7, %c0_8, %c0_9, %c0_10] : memref<1x1x8x8xf32, #tpu.memory_space<vmem>>, vector<1x1x8x8xf32>
    %11 = vector.shape_cast %10 : vector<1x1x8x8xf32> to vector<8x8xf32>
    %12 = vector.shape_cast %9 : vector<8x8xf32> to vector<1x1x8x8xf32>
    tpu.vector_store %arg10[%c0_7, %c0_8, %c0_9, %c0_10], %12 {strides = array<i32>} : memref<1x1x8x8xf32, #tpu.memory_space<vmem>>, vector<1x1x8x8xf32>,
    return
  }
  func.func @transform_0(%arg0: i32, %arg1: i32, %arg2: i32, %arg3: i32) -> (i32, i32, i32) {
    %c0_i32 = arith.constant 0 : i32
    %c0_i32_0 = arith.constant 0 : i32
    return %arg1, %arg2, %c0_i32 : i32, i32, i32
  }
  func.func @transform_1(%arg0: i32, %arg1: i32, %arg2: i32, %arg3: i32) -> (i32, i32, i32) {
    %c0_i32 = arith.constant 0 : i32
    %c0_i32_0 = arith.constant 0 : i32
    %c0_i32_1 = arith.constant 0 : i32
    return %arg0, %c0_i32, %c0_i32_0 : i32, i32, i32
  }
  func.func @transform_2(%arg0: i32, %arg1: i32, %arg2: i32, %arg3: i32) -> (i32, i32, i32) {
    %c0_i32 = arith.constant 0 : i32
    %c0_i32_0 = arith.constant 0 : i32
    return %arg1, %arg3, %c0_i32 : i32, i32, i32
  }
  func.func @transform_3(%arg0: i32, %arg1: i32, %arg2: i32, %arg3: i32) -> (i32, i32, i32) {
    %c0_i32 = arith.constant 0 : i32
    %c0_i32_0 = arith.constant 0 : i32
    %c0_i32_1 = arith.constant 0 : i32
    return %arg0, %c0_i32, %c0_i32_0 : i32, i32, i32
  }
  func.func @transform_4(%arg0: i32, %arg1: i32, %arg2: i32, %arg3: i32) -> (i32, i32, i32) {
    %c0_i32 = arith.constant 0 : i32
    %c0_i32_0 = arith.constant 0 : i32
    %c0_i32_1 = arith.constant 0 : i32
    return %arg0, %c0_i32, %c0_i32_0 : i32, i32, i32
  }
  func.func @transform_5(%arg0: i32, %arg1: i32, %arg2: i32, %arg3: i32) -> (i32, i32, i32) {
    %c0_i32 = arith.constant 0 : i32
    %c0_i32_0 = arith.constant 0 : i32
    %c0_i32_1 = arith.constant 0 : i32
    return %arg0, %c0_i32, %c0_i32_0 : i32, i32, i32
  }
  func.func @transform_6(%arg0: i32, %arg1: i32, %arg2: i32, %arg3: i32) -> (i32, i32, i32, i32) {
    %c0_i32 = arith.constant 0 : i32
    return %arg1, %arg0, %arg2, %arg3 : i32, i32, i32, i32
  }
}

</mosaic_0001>

<bundles_post_ra>
// kernel: tpu_custom_call.1
= control target key start
LH: loop header
LB: loop body
LE: loop exit
PB: predicated region body
PF: predicated region fallthrough
CT: control target
= control target key end

     0   :  { %s1192_s0 = inlined_call_operand.hbm [shape: f32[2,8,32], index: 0, kind: input, shape index: {}]   ;;  %s1193_s1 = inlined_call_operand.hbm [shape: f32[1,32,32], index: 1, kind: input, shape index: {}]   ;;  %s1194_s2 = inlined_call_operand.hbm [shape: f32[2,8,32], index: 2, kind: input, shape index: {}]   ;;  %s1195_s3 = inlined_call_operand.vmem [shape: f32[1,1,32], index: 3, kind: input, shape index: {}]   ;;  %s1196_s4 = inlined_call_operand.vmem [shape: f32[1,1,32], index: 4, kind: input, shape index: {}]   ;;  %s1197_s5 = inlined_call_operand.<no memory space> [shape: f32[1,1,1], index: 5, kind: input, shape index: {}]   ;;  %s1198_s6 = inlined_call_operand.hbm [shape: f32[2,1,8,8], index: 6, kind: output, shape index: {}]  }
   0x1   :  { %v11_v0 = vstv %s1197_s5 }
   0x2   :  { %12 = vst [vmem:[#allocation4] sm:$0x1] %v11_v0 }
   0x3   :  { %13 = vsyncpa [#allocation6], 0 }
   0x4   :  { %15 = vsyncpa [#allocation6 + $0x1], 0 }
   0x5   :  { %16 = vsyncpa [#allocation9], 0 }
   0x6   :  { %17 = vsyncpa [#allocation7], 0 }
   0x7   :  { %19 = vsyncpa [#allocation7 + $0x1], 0  ;;  %s1011_s23 = smov 0   ;;  %s1013_s24 = smov 0  }
   0x8   :  { %s1015_s25 = smov 0   ;;  %s1017_s26 = smov 0  }
   0x9   :  { %s1019_s27 = smov 0   ;;  %s1021_s28 = smov 0  }
   0xa LB: > { %s1042_s5 = sadd.s32 4294967295, %s967_s28   ;;  %s679_s29 = sadd.s32 4294967294, %s967_s28   ;;  %s967_s28 = sphi %s1021_s28, %s25_s28   ;;  %s963_s27 = sphi %s1019_s27, %s1212_s27   ;;  %s959_s26 = sphi %s1017_s26, %s1211_s26   ;;  %s955_s25 = sphi %s1015_s25, %s1210_s25   ;;  %s951_s24 = sphi %s1013_s24, %s1209_s24   ;;  %s947_s23 = sphi %s1011_s23, %s1208_s23  }
   0xb   : > { %s47_s30 = sadd.s32 1, %s963_s27  ;;  %s60_s7 = sadd.s32 1, %s955_s25 }
   0xc   : > { %p49_p0 = scmp.ge.s32.totalorder %s47_s30, 2  ;;  %p67_p1 = scmp.ne.s32.totalorder %s955_s25, %s951_s24 }
   0xd   : > { %p68_p2 = scmp.eq.s32.totalorder %s967_s28, 0  ;;  %p73_p3 = scmp.ne.s32.totalorder %s951_s24, %s947_s23 }
   0xe   : > { %s1214_s30 = smov (%p49_p0, %s47_s30), 0  ;;  %p235_p5 = scmp.eq.s32.totalorder %s1042_s5, 1 }
   0xf   : > { %1200 = sst [smem:[#allocation16_spill]] %s1214_s30  ;;  %p1054_p4 = por %p68_p2, %p67_p1 }
  0x10   : > { %s55_s9 = ssub.s32 %s963_s27, %s1214_s30  ;;  %p241_p6 = scmp.eq.s32.totalorder %s679_s29, 1 }
  0x11   : > { %p58_p7 = scmp.eq.s32.totalorder %s55_s9, 0  ;;  %p1061_p8 = por %p235_p5, %p67_p1 }
  0x12   : > { %p1068_p9 = por %p241_p6, %p73_p3  ;;  %p685_p10 = scmp.ge.s32.totalorder %s967_s28, 2 }
  0x13   : > { %s1073_s12 = scalar_select %p58_p7, %s955_s25, %s60_s7  }
  0x14   : > { %p728_p11 = scmp.lt.s32.totalorder %s967_s28, 2  ;;  %s296_s13 = sand.u32 1, %s967_s28  }
  0x15   : > { %s298_s14 = sand.u32 1, %s955_s25   ;;  %s687_s16 = sshll.u32 %s963_s27, 3 }
  0x16   : > { %s686_s15 = sshll.u32 %s298_s14, 3  ;;  %s305_s19 = scalar_lea.hbm %s1192_s0, %s687_s16 }
  0x17   : > { %s300_s20 = scalar_lea.vmem [#allocation5], %s686_s15  ;;  %s307_s22 = sshll.u32 %s305_s19, 4  ;;  %s308_s22 = int_to_ptr.hbm [resolvable:$true] %s307_s22 }
  0x18   : > { %s309_s21 = sshll.u32 %s300_s20, 4  ;;  %p1085_p12 = pnand %p728_p11, %p1054_p4  ;;  %s310_s21 = int_to_ptr.vmem [resolvable:$true] %s309_s21 }
  0x19   : > { %s325_s14 = scalar_lea.hbm %s1194_s2, %s687_s16  ;;  %s297_s30 = scalar_lea.sflag [#allocation6], %s296_s13 }
  0x1a   : > { %719 = dma.hbm_to_vmem [thread:$0]  (!%p1085_p12), %s308_s22, 128, %s310_s21, %s297_s30  }
  0x1b   : > { %p74_p13 = scmp.eq.s32.totalorder %s1042_s5, 0  ;;  %p680_p0 = scmp.ge.s32.totalorder %s967_s28, 1 }
  0x1c   : > { %p248_p1 = scmp.lt.s32.totalorder %s967_s28, 3  ;;  %s262_s19 = sshll.u32 %s1193_s1, 4  ;;  %s263_s19 = int_to_ptr.hbm [resolvable:$true] %s262_s19 }
  0x1d   : > { %p1102_p2 = por %p74_p13, %p73_p3  ;;  %s969_s13 = smov [#allocation8]  }
  0x1e   : > { %p1109_p4 = pnand %p680_p0, %p248_p1  ;;  %s264_s16 = sshll.u32 %s969_s13, 4  ;;  %s265_s16 = int_to_ptr.vmem [resolvable:$true] %s264_s16 }
  0x1f   : > { %s327_s21 = sshll.u32 %s325_s14, 4  ;;  %s320_s22 = scalar_lea.vmem [#allocation10], %s686_s15  ;;  %s328_s21 = int_to_ptr.hbm [resolvable:$true] %s327_s21 }
  0x20   : > { %p712_p5 = pneg %p1109_p4  ;;  %s329_s7 = sshll.u32 %s320_s22, 4  ;;  %s330_s7 = int_to_ptr.vmem [resolvable:$true] %s329_s7 }
  0x21   : > { %s970_s9 = smov 128   ;;  %s971_s17 = smov 8  }
  0x22   : > { %p713_p3 = pnand %p712_p5, %p74_p13  ;;  %338 = sbr.rel (%p1109_p4) target bundleno = 320 (0x140), region = 44 }
  0x23   : > { %722 = dma.hbm_to_vmem [thread:$0]  (!%p1085_p12), %s328_s21, 128, %s330_s7, %s297_s30  }
  0x24   : > { %715 = dma.hbm_to_vmem [thread:$0]  (!%p713_p3), %s263_s19, 512, %s265_s16, [#allocation9], %s970_s9, %s970_s9, %s971_s17  }
  0x25   : > { %s340_s18 = sand.u32 (!%p1109_p4), 1, %s1042_s5   ;;  %s342_s13 = sand.u32 (!%p1109_p4), 1, %s951_s24  }
  0x26   : > { %s1125_s14 = sshll.u32 (!%p1109_p4), %s342_s13, 3  ;;  %s341_s15 = scalar_lea.sflag (!%p1109_p4), [#allocation6], %s340_s18 }
  0x27   : > { %s344_s22 = scalar_lea.vmem [#allocation5], %s1125_s14 }
  0x28   : > { %930 = dma.done.wait (%p1102_p2), %s341_s15, 128  }
  0x29   : > { %932 = vsyncadd (%p1102_p2), %s341_s15, 4294967168 }
  0x2a   : > { %934 = dma.done.wait (%p74_p13), [#allocation9], 512  }
  0x2b   : > { %936 = vsyncadd (%p74_p13), [#allocation9], 4294966784  ;;  %s359_s30 = scalar_lea.vmem [#allocation10], %s1125_s14 }
  0x2c   : > { %938 = dma.done.wait (%p1102_p2), %s341_s15, 128  }
  0x2d   : > { %940 = vsyncadd (%p1102_p2), %s341_s15, 4294967168  ;;  %v420_v1 = vld [vmem:[#allocation8 + $0x18] sm:$0xff]  ;;  %v419_v2 = vld [vmem:[#allocation8 + $0x10] sm:$0xff]  ;;  %vm425_vm0 = vcmask 261120   ;;  %v972_v10 = vmov 0   ;;  %vm463_vm1 = vcmask 7168  }
  0x2e   : > { %441 = vmatpush.msra.mxu0 %v420_v1  ;;  %v418_v3 = vld [vmem:[#allocation8 + $0x8] sm:$0xff]  ;;  %v784_v4 = vld [vmem:[%s1195_s3] ss:$0 sm:$0xff]  ;;  %v417_v6 = vld [vmem:[#allocation8] sm:$0xff]  ;;  %783 = vset.pattern.permute.xlu0 %v972_v10  ;;  %s699_s20 = sshll.u32 %s959_s26, 3  ;;  %s402_s9 = scalar_lea.vmem [#allocation11], %s1125_s14 }
  0x2f   : > { %v416_v5 = vld [vmem:[%s344_s22] sm:$0xff]  ;;  %v466_v9 = vld [vmem:[%s359_s30] sm:$0xff]  ;;  %s516_s7 = scalar_lea.hbm %s1198_s6, %s699_s20  ;;  %s518_s17 = sshll.u32 %s402_s9, 4  ;;  %vm500_vm2 = vcmask 64512   ;;  %s519_s17 = int_to_ptr.vmem [resolvable:$true] %s518_s17 }
  0x30   : > { %442 = vmatpush.msra.mxu0 %v419_v2  ;;  %v454_v7 = vmul.f32 %v784_v4, %v416_v5  ;;  %696 = vmatpush.xpose.msk.msra.mxu1 %vm425_vm0, %v466_v9  ;;  %v786_v11 = vld [vmem:[#allocation4] ss:$0 sm:$0xff]  ;;  %v785_v14 = vld [vmem:[%s1196_s4] ss:$0 sm:$0xff]  ;;  %s520_s18 = sshll.u32 %s516_s7, 4  ;;  %s503_s15 = scalar_lea.sflag [#allocation7], %s342_s13  ;;  %s521_s18 = int_to_ptr.hbm [resolvable:$true] %s520_s18 }
  0x31   : > { %s891_s22 = sshra.s32 %s521_s18, 4  ;;  %s897_s14 = scalar_lea.hbm %s1198_s6, 16  ;;  %s892_s22 = int_to_ptr.hbm [resolvable:$true] %s891_s22 }
  0x32   : > { %443 = vmatpush.msra.mxu0 %v418_v3  ;;  %v455_v8 = vsel %vm425_vm0, %v454_v7, 0.0  ;;  %s893_s26 = scalar_lea.hbm %s892_s22, 8  ;;  %p898_p12 = scmp.lt.s32.totalorder %s892_s22, %s1198_s6 }
  0x33   : > { %456 = vadd.xlane.f32.xlu0 %v455_v8  ;;  %p894_p6 = scmp.ne.s32.totalorder %s892_s22, %s893_s26  ;;  %p899_p13 = scmp.lt.s32.totalorder %s897_s14, %s893_s26 }
  0x34   : > { %444 = vmatpush.msra.mxu0 %v417_v6 }
  0x35   : > { %695 = vmatmul.msk.f32.vlgmr.msra.gmra.mxu0 %vm425_vm0, %v416_v5  ;;  %p895_p7 = pnand %p894_p6, %p1061_p8  ;;  %p900_p0 = por %p899_p13, %p898_p12 }
  0x37   : > { %p896_p11 = pneg %p895_p7 }
  0x39   : > { %p901_p1 = pnand %p900_p0, %p896_p11 }
  0xa6   : > { %v457_v12 = vpop.xlane.xlu0 %456 }
  0xa7   : > { %v462_v13 = vadd.f32 %v786_v11, %v457_v12 }
  0xa9   : > { %464 = vst.msk [vmem:[#allocation3] sm:$0xff] %vm463_vm1, %v462_v13 }
  0xb0   : > { %v467_v15 = vld [vmem:[#allocation3] sm:$0xff] }
  0xb1   : > { %470 = vperm.xlu0 %783, %v467_v15  }
  0xb2   : > { %v446_v16 = vpop.f32.mrf.mxu0 }
  0xb3   : > { %v447_v17 = vadd.f32 %v785_v14, %v446_v16 }
  0xb5   : > { %449 = vst.msk [vmem:[#allocation2] sm:$0xff] %vm425_vm0, %v447_v17 }
  0xbc   : > { %v465_v18 = vld [vmem:[#allocation2] sm:$0xff] }
  0xbd   : > { %697 = vmatmul.msk.f32.vlgmr.msra.gmra.mxu1 %vm425_vm0, %v465_v18 }
 0x123   : > { %v471_v19 = vpop.permute.xlu0 %470 }
 0x13a   : > { %v497_v20 = vpop.f32.mrf.mxu1 }
 0x13b   : > { %v498_v21 = vadd.f32 %v497_v20, %v471_v19 }
 0x13d   : > { %501 = vst.msk [vmem:[%s402_s9] sm:$0xff] %vm500_vm2, %v498_v21 }
 0x13e   : > { %904 = shalt.err (!%p901_p1)
}
 0x13f   : > { %710 = dma.vmem_to_hbm [thread:$0]  (%p1061_p8), %s519_s17, 128, %s521_s18, %s503_s15  }
 0x140 PF: > { %s532_s13 = sand.u32 1, %s947_s23   ;;  %p724_p2 = pnand %p685_p10, %p1068_p9 }
 0x141   : > { %s533_s8 = scalar_lea.sflag [#allocation7], %s532_s13 }
 0x142   : > { %p725_p4 = pneg %p724_p2 }
 0x144   : > { %942 = dma.done.wait (%p725_p4), %s533_s8, 128  }
 0x145   : > { %944 = vsyncadd (%p725_p4), %s533_s8, 4294967168  ;;  %s25_s28 = sadd.s32 1, %s967_s28   ;;  %s1207_s10 = sld [smem:[#allocation16_spill]] }
 0x146   : > { %p22_p5 = scmp.ge.s32.totalorder %s25_s28, 4   ;;  %s1208_s23 = smov %s951_s24 }
 0x147   : > { %s1209_s24 = smov %s955_s25  ;;  %s1210_s25 = smov %s1073_s12 }
 0x148   : > { %s1211_s26 = smov %s963_s27  ;;  %24 = sbr.rel (!%p22_p5) target bundleno = 10 (0xa), region = 118 }
 0x14b   : > { %s1212_s27 = smov %s1207_s10 }
 0x14d   :  { %539 = vsyncpa [#allocation6], 1 }
 0x14e   :  { %541 = vsyncpa [#allocation6 + $0x1], 1 }
 0x14f   :  { %542 = vsyncpa [#allocation9], 1 }
 0x150   :  { %543 = vsyncpa [#allocation7], 1 }
 0x151   :  { %545 = vsyncpa [#allocation7 + $0x1], 1 }

</bundles_post_ra>
